<compile_context>
chip_gen: v7x
topology: tpu7x:2x2x1
jax: 0.10.0
libtpu: 0.0.40
codegen_flags: <defaults>
</compile_context>

<pallas_src>
import functools
import math

import jax
import jax.numpy as jnp
from jax.experimental import pallas as pl
from jax.experimental.pallas import tpu as pltpu

_BG = 8  # batch rows per grid step (one sublane group)


def _round_up(x, m):
    return ((x + m - 1) // m) * m


def _fused_rnn_kernel(x0p_hbm, wih_ref, whh_ref, b_ref, out_hbm, seq_ref, *,
                      seq_len, num_layers, proj_chunk_t, unroll, compute_dtype):
    """All layers + full time recurrence for one batch group of 8 rows.

    x0p_hbm : (T, Bp, Hp) f32 HBM   hoisted layer-0 pre-activations x @ W_ih0^T + b0
    wih_ref : (L, Hp, Hp) VMEM      per-layer W_ih^T (layer-0 slot unused / zero)
    whh_ref : (L, Hp, Hp) VMEM      per-layer W_hh^T
    b_ref   : (L, 1, Hp) f32 VMEM   per-layer b_ih + b_hh (layer-0 folded into x0p)
    out_hbm : (T, Bp, Hp) f32 HBM   output (aliases x0p_hbm)
    seq_ref : (T, 8, Hp) f32 VMEM   the single resident working sequence buffer
    """
    T = seq_len
    _, BG, Hp = seq_ref.shape
    g = pl.program_id(0)
    b0 = pl.multiple_of(g * BG, BG)

    # One HBM->VMEM DMA of this batch group's pre-activations straight into the
    # working buffer: the sequence is resident in VMEM exactly once, no extra copy.
    pltpu.sync_copy(x0p_hbm.at[:, pl.ds(b0, BG), :], seq_ref)

    for layer in range(num_layers):  # static Python loop, L is small
        if layer > 0:
            wih_l = wih_ref[layer]
            bias_l = b_ref[layer]
            # Hoisted input projection for this layer, chunked over T so the transient
            # dot result never adds another full (T, 8, Hp) buffer to peak VMEM.
            for t0 in range(0, T, proj_chunk_t):
                tc = min(proj_chunk_t, T - t0)
                xt = seq_ref[pl.ds(t0, tc)].reshape(tc * BG, Hp)
                proj = jnp.dot(xt.astype(compute_dtype), wih_l,
                               preferred_element_type=jnp.float32) + bias_l
                seq_ref[pl.ds(t0, tc)] = proj.reshape(tc, BG, Hp)

        whh_l = whh_ref[layer]  # (Hp, Hp), loaded once per layer

        def step(t, h, whh_l=whh_l):
            # Only the recurrent matmul + tanh remain on the serial critical path.
            pre = seq_ref[t] + jnp.dot(h.astype(compute_dtype), whh_l,
                                       preferred_element_type=jnp.float32)
            h_new = jnp.tanh(pre)
            seq_ref[t] = h_new  # overwritten in place: becomes next layer's input
            return h_new

        h0 = jnp.zeros((BG, Hp), jnp.float32)
        jax.lax.fori_loop(0, T, step, h0, unroll=unroll)

    # Write the finished last-layer hidden states for this batch group back to HBM.
    pltpu.sync_copy(seq_ref, out_hbm.at[:, pl.ds(b0, BG), :])


def rnn_dynamics_forward(x_btf, params, *, weights_in_bf16=False):
    """Equivalent of RNNDynamics.forward: out, _ = self.rnn(x); return out.

    x_btf : (B, T, input_dim)  batch_first input
    params: list per layer of PyTorch-shaped (w_ih (H, Din), w_hh (H, H),
            b_ih (H,), b_hh (H,))
    returns (B, T, H) last-layer hidden states at every time step.
    """
    B, T, _ = x_btf.shape
    H = params[0][1].shape[0]
    L = len(params)
    Bp = _round_up(max(B, _BG), _BG)
    G = Bp // _BG                       # batch groups -> grid ("parallel": v7x 2 TCs)
    Hp = _round_up(max(H, 128), 128)    # lane-dense last dim

    f32 = jnp.float32
    w_dtype = jnp.bfloat16 if weights_in_bf16 else f32

    # Hoisted layer-0 input projection over the whole sequence (one XLA matmul),
    # produced directly in the time-major padded layout the kernel wants.
    w_ih0, _, b_ih0, b_hh0 = params[0]
    x0p = jnp.einsum("btf,hf->tbh", x_btf.astype(f32), w_ih0.astype(f32))
    x0p = x0p + (b_ih0 + b_hh0).astype(f32)
    x0p = jnp.pad(x0p, ((0, 0), (0, Bp - B), (0, Hp - H)))

    # Stack padded weights once; zero padding keeps padded H lanes identically zero.
    # NOTE: the layer>0 bias broadcast makes padded *batch* rows nonzero through the
    # recurrence; they are sliced off below, but never reduce over batch in-kernel.
    wih = jnp.zeros((L, Hp, Hp), f32)
    whh = jnp.zeros((L, Hp, Hp), f32)
    bias = jnp.zeros((L, 1, Hp), f32)
    for l, (w_ih_l, w_hh_l, b_ih_l, b_hh_l) in enumerate(params):
        whh = whh.at[l, :H, :H].set(w_hh_l.T.astype(f32))
        if l > 0:
            wih = wih.at[l, :H, :H].set(w_ih_l.T.astype(f32))
            bias = bias.at[l, 0, :H].set((b_ih_l + b_hh_l).astype(f32))
    wih = wih.astype(w_dtype)
    whh = whh.astype(w_dtype)

    # Keep the transient per-chunk projection result at ~2048 lane-dense rows (~1 MiB).
    proj_chunk_t = max(1, min(T, 2048 // _BG))

    # Per-generation VMEM budget: one (T, 8, Hp) working sequence + weights + the
    # projection chunk transients + headroom for Mosaic internal scratch, capped at
    # 85% of the physical capacity (v5e/v6e: 128 MiB, v7x: 64 MiB).
    w_itemsize = jnp.dtype(w_dtype).itemsize
    need = (T * _BG * Hp * 4                      # resident sequence scratch
            + 2 * L * Hp * Hp * w_itemsize        # W_ih^T / W_hh^T stacks
            + L * Hp * 4                          # biases
            + 3 * proj_chunk_t * _BG * Hp * 4     # chunked projection transients
            + (8 << 20))                          # headroom
    try:
        vmem_cap = pltpu.get_tpu_info().vmem_capacity_bytes
    except Exception:
        vmem_cap = 64 << 20  # conservative fallback: smallest per-core VMEM (v7x)
    vmem_limit = int(min(max(need, 32 << 20), 0.85 * vmem_cap))

    kernel = functools.partial(
        _fused_rnn_kernel,
        seq_len=T,
        num_layers=L,
        proj_chunk_t=proj_chunk_t,
        # TODO(synk): sweep unroll (4/8/16) against the bundle dump; the best value
        # depends on whether MXU drain or EUP tanh dominates the per-step chain.
        unroll=True if T <= 64 else 8,
        compute_dtype=w_dtype,
    )

    hbm = pl.BlockSpec(memory_space=pl.ANY)   # stays in HBM; kernel DMAs its slice
    out_tbh = pl.pallas_call(
        kernel,
        out_shape=jax.ShapeDtypeStruct((T, Bp, Hp), f32),
        grid=(G,),
        in_specs=[
            hbm,                                              # x0p (aliased to output)
            pl.BlockSpec((L, Hp, Hp), lambda g: (0, 0, 0)),   # W_ih^T stack
            pl.BlockSpec((L, Hp, Hp), lambda g: (0, 0, 0)),   # W_hh^T stack
            pl.BlockSpec((L, 1, Hp), lambda g: (0, 0, 0)),    # biases
        ],
        out_specs=pl.BlockSpec(memory_space=pl.ANY),
        scratch_shapes=[pltpu.VMEM((T, _BG, Hp), f32)],
        input_output_aliases={0: 0},   # donate x0p's HBM buffer to the output
        compiler_params=pltpu.CompilerParams(
            dimension_semantics=("parallel",),
            vmem_limit_bytes=vmem_limit,
        ),
    )(x0p, wih, whh, bias)

    # Slice off padding and return batch_first like nn.RNN(batch_first=True).
    return jnp.transpose(out_tbh[:, :B, :H], (1, 0, 2)).astype(x_btf.dtype)


def init_rnn_params(key, input_dim, hidden_size, num_layers, dtype=jnp.float32):
    """PyTorch-style init: U(-1/sqrt(H), 1/sqrt(H)) for all weights/biases."""
    bound = 1.0 / math.sqrt(hidden_size)
    params = []
    d_in = input_dim
    for _ in range(num_layers):
        key, k1, k2, k3, k4 = jax.random.split(key, 5)
        w_ih = jax.random.uniform(k1, (hidden_size, d_in), dtype, -bound, bound)
        w_hh = jax.random.uniform(k2, (hidden_size, hidden_size), dtype, -bound, bound)
        b_ih = jax.random.uniform(k3, (hidden_size,), dtype, -bound, bound)
        b_hh = jax.random.uniform(k4, (hidden_size,), dtype, -bound, bound)
        params.append((w_ih, w_hh, b_ih, b_hh))
        d_in = hidden_size
    return params


def rnn_reference(x_btf, params):
    """Pure-JAX reference (lax.scan) for correctness checking."""
    h_seq = jnp.transpose(x_btf, (1, 0, 2))
    B = x_btf.shape[0]
    for (w_ih, w_hh, b_ih, b_hh) in params:
        H = w_hh.shape[0]

        def step(h, x_t, w_ih=w_ih, w_hh=w_hh, b_ih=b_ih, b_hh=b_hh):
            h_new = jnp.tanh(x_t @ w_ih.T + b_ih + h @ w_hh.T + b_hh)
            return h_new, h_new

        h0 = jnp.zeros((B, H), x_btf.dtype)
        _, h_seq = jax.lax.scan(step, h0, h_seq)
    return jnp.transpose(h_seq, (1, 0, 2))


if __name__ == "__main__":
    # Small shapes consistent with RNNDynamics(input_dim, hidden_size, num_layers).
    batch, seq, input_dim, hidden_size, num_layers = 2, 8, 4, 32, 2

    key = jax.random.PRNGKey(0)
    key, xkey = jax.random.split(key)
    x = jax.random.normal(xkey, (batch, seq, input_dim), jnp.float32)
    params = init_rnn_params(key, input_dim, hidden_size, num_layers)

    fwd = jax.jit(rnn_dynamics_forward)
    out = jax.block_until_ready(fwd(x, params))
    ref = jax.block_until_ready(rnn_reference(x, params))

    assert out.shape == (batch, seq, hidden_size)
    assert jnp.allclose(out, ref, atol=1e-5, rtol=1e-5), "mismatch vs JAX reference"
    print("KERNEL_OK")
</pallas_src>

<mosaic_0001>
module attributes {stable_mosaic.version = 11 : i64} {
  func.func @_fused_rnn_kernel(%arg0: i32, %arg1: memref<8x8x128xf32, #tpu.memory_space<any>>, %arg2: memref<2x128x128xf32, #tpu.memory_space<vmem>>, %arg3: memref<2x128x128xf32, #tpu.memory_space<vmem>>, %arg4: memref<2x1x128xf32, #tpu.memory_space<vmem>>, %arg5: memref<8x8x128xf32, #tpu.memory_space<any>>, %arg6: memref<8x8x128xf32, #tpu.memory_space<vmem>>) attributes {dimension_semantics = [#tpu.dimension_semantics<parallel>], iteration_bounds = array<i64: 1>, scalar_prefetch = 0 : i64, scratch_operands = 1 : i64, tpu.core_type = #tpu.core_type<tc>, window_params = [{}, {pipeline_mode = #tpu.pipeline_mode<synchronous>, transform_indices = @transform_1, window_bounds = array<i64: 2, 128, 128>}, {pipeline_mode = #tpu.pipeline_mode<synchronous>, transform_indices = @transform_2, window_bounds = array<i64: 2, 128, 128>}, {pipeline_mode = #tpu.pipeline_mode<synchronous>, transform_indices = @transform_3, window_bounds = array<i64: 2, 1, 128>}, {}]} {
    %c8_i32 = arith.constant 8 : i32
    %0 = arith.muli %arg0, %c8_i32 : i32
    %1 = tpu.assume_multiple %0, 8 : i32
    "tpu.region"() ({
      %179 = tpu.sem_alloc : memref<!tpu.dma_semaphore, #tpu.memory_space<semaphore_mem>>
      %c0_i32_108 = arith.constant 0 : i32
      %c0_i32_109 = arith.constant 0 : i32
      %180 = tpu.memref_slice %arg1[%c0_i32_108, %1, %c0_i32_109] : memref<8x8x128xf32, #tpu.memory_space<any>> -> memref<8x8x128xf32, #tpu.memory_space<any>>
      tpu.enqueue_dma source(%180 : memref<8x8x128xf32, #tpu.memory_space<any>>) target(%arg6 : memref<8x8x128xf32, #tpu.memory_space<vmem>>) target_semaphore(%179 : memref<!tpu.dma_semaphore, #tpu.memory_space<semaphore_mem>>)
      %c0_i32_110 = arith.constant 0 : i32
      %c0_i32_111 = arith.constant 0 : i32
      %181 = tpu.memref_slice %arg1[%c0_i32_110, %1, %c0_i32_111] : memref<8x8x128xf32, #tpu.memory_space<any>> -> memref<8x8x128xf32, #tpu.memory_space<any>>
      tpu.wait_dma2 semaphore(%179 : memref<!tpu.dma_semaphore, #tpu.memory_space<semaphore_mem>>) src(%181 : memref<8x8x128xf32, #tpu.memory_space<any>>) dst(%arg6 : memref<8x8x128xf32, #tpu.memory_space<vmem>>)
      tpu.yield
    }) : () -> ()
    %c0 = arith.constant 0 : index
    %c0_0 = arith.constant 0 : index
    %c0_1 = arith.constant 0 : index
    %2 = vector.load %arg3[%c0, %c0_0, %c0_1] : memref<2x128x128xf32, #tpu.memory_space<vmem>>, vector<1x128x128xf32>
    %3 = vector.shape_cast %2 : vector<1x128x128xf32> to vector<128x128xf32>
    %cst = arith.constant 0.000000e+00 : f32
    %4 = vector.broadcast %cst : f32 to vector<8x128xf32>
    %c0_i32 = arith.constant 0 : i32
    %5 = arith.index_cast %c0_i32 : i32 to index
    %c0_2 = arith.constant 0 : index
    %c0_3 = arith.constant 0 : index
    %6 = vector.load %arg6[%5, %c0_2, %c0_3] : memref<8x8x128xf32, #tpu.memory_space<vmem>>, vector<1x8x128xf32>
    %7 = vector.shape_cast %6 : vector<1x8x128xf32> to vector<8x128xf32>
    %cst_4 = arith.constant dense<0.000000e+00> : vector<8x128xf32>
    %8 = tpu.matmul %4, %3, %cst_4 {dimension_numbers = #tpu.dot_dimension_numbers<[1], [0], [0], [1], [0, 0, 1, 1], [], []>} : vector<8x128xf32>, vector<128x128xf32>, vector<8x128xf32> -> vector<8x128xf32>
    %9 = arith.addf %7, %8 : vector<8x128xf32>
    %10 = math.tanh %9 : vector<8x128xf32>
    %11 = arith.index_cast %c0_i32 : i32 to index
    %c0_5 = arith.constant 0 : index
    %c0_6 = arith.constant 0 : index
    %12 = vector.load %arg6[%11, %c0_5, %c0_6] : memref<8x8x128xf32, #tpu.memory_space<vmem>>, vector<1x8x128xf32>
    %13 = vector.shape_cast %12 : vector<1x8x128xf32> to vector<8x128xf32>
    %14 = vector.shape_cast %10 : vector<8x128xf32> to vector<1x8x128xf32>
    tpu.vector_store %arg6[%11, %c0_5, %c0_6], %14 {strides = array<i32>} : memref<8x8x128xf32, #tpu.memory_space<vmem>>, vector<1x8x128xf32>,
    %c1_i32 = arith.constant 1 : i32
    %15 = arith.index_cast %c1_i32 : i32 to index
    %c0_7 = arith.constant 0 : index
    %c0_8 = arith.constant 0 : index
    %16 = vector.load %arg6[%15, %c0_7, %c0_8] : memref<8x8x128xf32, #tpu.memory_space<vmem>>, vector<1x8x128xf32>
    %17 = vector.shape_cast %16 : vector<1x8x128xf32> to vector<8x128xf32>
    %cst_9 = arith.constant dense<0.000000e+00> : vector<8x128xf32>
    %18 = tpu.matmul %10, %3, %cst_9 {dimension_numbers = #tpu.dot_dimension_numbers<[1], [0], [0], [1], [0, 0, 1, 1], [], []>} : vector<8x128xf32>, vector<128x128xf32>, vector<8x128xf32> -> vector<8x128xf32>
    %19 = arith.addf %17, %18 : vector<8x128xf32>
    %20 = math.tanh %19 : vector<8x128xf32>
    %21 = arith.index_cast %c1_i32 : i32 to index
    %c0_10 = arith.constant 0 : index
    %c0_11 = arith.constant 0 : index
    %22 = vector.load %arg6[%21, %c0_10, %c0_11] : memref<8x8x128xf32, #tpu.memory_space<vmem>>, vector<1x8x128xf32>
    %23 = vector.shape_cast %22 : vector<1x8x128xf32> to vector<8x128xf32>
    %24 = vector.shape_cast %20 : vector<8x128xf32> to vector<1x8x128xf32>
    tpu.vector_store %arg6[%21, %c0_10, %c0_11], %24 {strides = array<i32>} : memref<8x8x128xf32, #tpu.memory_space<vmem>>, vector<1x8x128xf32>,
    %c2_i32 = arith.constant 2 : i32
    %25 = arith.index_cast %c2_i32 : i32 to index
    %c0_12 = arith.constant 0 : index
    %c0_13 = arith.constant 0 : index
    %26 = vector.load %arg6[%25, %c0_12, %c0_13] : memref<8x8x128xf32, #tpu.memory_space<vmem>>, vector<1x8x128xf32>
    %27 = vector.shape_cast %26 : vector<1x8x128xf32> to vector<8x128xf32>
    %cst_14 = arith.constant dense<0.000000e+00> : vector<8x128xf32>
    %28 = tpu.matmul %20, %3, %cst_14 {dimension_numbers = #tpu.dot_dimension_numbers<[1], [0], [0], [1], [0, 0, 1, 1], [], []>} : vector<8x128xf32>, vector<128x128xf32>, vector<8x128xf32> -> vector<8x128xf32>
    %29 = arith.addf %27, %28 : vector<8x128xf32>
    %30 = math.tanh %29 : vector<8x128xf32>
    %31 = arith.index_cast %c2_i32 : i32 to index
    %c0_15 = arith.constant 0 : index
    %c0_16 = arith.constant 0 : index
    %32 = vector.load %arg6[%31, %c0_15, %c0_16] : memref<8x8x128xf32, #tpu.memory_space<vmem>>, vector<1x8x128xf32>
    %33 = vector.shape_cast %32 : vector<1x8x128xf32> to vector<8x128xf32>
    %34 = vector.shape_cast %30 : vector<8x128xf32> to vector<1x8x128xf32>
    tpu.vector_store %arg6[%31, %c0_15, %c0_16], %34 {strides = array<i32>} : memref<8x8x128xf32, #tpu.memory_space<vmem>>, vector<1x8x128xf32>,
    %c3_i32 = arith.constant 3 : i32
    %35 = arith.index_cast %c3_i32 : i32 to index
    %c0_17 = arith.constant 0 : index
    %c0_18 = arith.constant 0 : index
    %36 = vector.load %arg6[%35, %c0_17, %c0_18] : memref<8x8x128xf32, #tpu.memory_space<vmem>>, vector<1x8x128xf32>
    %37 = vector.shape_cast %36 : vector<1x8x128xf32> to vector<8x128xf32>
    %cst_19 = arith.constant dense<0.000000e+00> : vector<8x128xf32>
    %38 = tpu.matmul %30, %3, %cst_19 {dimension_numbers = #tpu.dot_dimension_numbers<[1], [0], [0], [1], [0, 0, 1, 1], [], []>} : vector<8x128xf32>, vector<128x128xf32>, vector<8x128xf32> -> vector<8x128xf32>
    %39 = arith.addf %37, %38 : vector<8x128xf32>
    %40 = math.tanh %39 : vector<8x128xf32>
    %41 = arith.index_cast %c3_i32 : i32 to index
    %c0_20 = arith.constant 0 : index
    %c0_21 = arith.constant 0 : index
    %42 = vector.load %arg6[%41, %c0_20, %c0_21] : memref<8x8x128xf32, #tpu.memory_space<vmem>>, vector<1x8x128xf32>
    %43 = vector.shape_cast %42 : vector<1x8x128xf32> to vector<8x128xf32>
    %44 = vector.shape_cast %40 : vector<8x128xf32> to vector<1x8x128xf32>
    tpu.vector_store %arg6[%41, %c0_20, %c0_21], %44 {strides = array<i32>} : memref<8x8x128xf32, #tpu.memory_space<vmem>>, vector<1x8x128xf32>,
    %c4_i32 = arith.constant 4 : i32
    %45 = arith.index_cast %c4_i32 : i32 to index
    %c0_22 = arith.constant 0 : index
    %c0_23 = arith.constant 0 : index
    %46 = vector.load %arg6[%45, %c0_22, %c0_23] : memref<8x8x128xf32, #tpu.memory_space<vmem>>, vector<1x8x128xf32>
    %47 = vector.shape_cast %46 : vector<1x8x128xf32> to vector<8x128xf32>
    %cst_24 = arith.constant dense<0.000000e+00> : vector<8x128xf32>
    %48 = tpu.matmul %40, %3, %cst_24 {dimension_numbers = #tpu.dot_dimension_numbers<[1], [0], [0], [1], [0, 0, 1, 1], [], []>} : vector<8x128xf32>, vector<128x128xf32>, vector<8x128xf32> -> vector<8x128xf32>
    %49 = arith.addf %47, %48 : vector<8x128xf32>
    %50 = math.tanh %49 : vector<8x128xf32>
    %51 = arith.index_cast %c4_i32 : i32 to index
    %c0_25 = arith.constant 0 : index
    %c0_26 = arith.constant 0 : index
    %52 = vector.load %arg6[%51, %c0_25, %c0_26] : memref<8x8x128xf32, #tpu.memory_space<vmem>>, vector<1x8x128xf32>
    %53 = vector.shape_cast %52 : vector<1x8x128xf32> to vector<8x128xf32>
    %54 = vector.shape_cast %50 : vector<8x128xf32> to vector<1x8x128xf32>
    tpu.vector_store %arg6[%51, %c0_25, %c0_26], %54 {strides = array<i32>} : memref<8x8x128xf32, #tpu.memory_space<vmem>>, vector<1x8x128xf32>,
    %c5_i32 = arith.constant 5 : i32
    %55 = arith.index_cast %c5_i32 : i32 to index
    %c0_27 = arith.constant 0 : index
    %c0_28 = arith.constant 0 : index
    %56 = vector.load %arg6[%55, %c0_27, %c0_28] : memref<8x8x128xf32, #tpu.memory_space<vmem>>, vector<1x8x128xf32>
    %57 = vector.shape_cast %56 : vector<1x8x128xf32> to vector<8x128xf32>
    %cst_29 = arith.constant dense<0.000000e+00> : vector<8x128xf32>
    %58 = tpu.matmul %50, %3, %cst_29 {dimension_numbers = #tpu.dot_dimension_numbers<[1], [0], [0], [1], [0, 0, 1, 1], [], []>} : vector<8x128xf32>, vector<128x128xf32>, vector<8x128xf32> -> vector<8x128xf32>
    %59 = arith.addf %57, %58 : vector<8x128xf32>
    %60 = math.tanh %59 : vector<8x128xf32>
    %61 = arith.index_cast %c5_i32 : i32 to index
    %c0_30 = arith.constant 0 : index
    %c0_31 = arith.constant 0 : index
    %62 = vector.load %arg6[%61, %c0_30, %c0_31] : memref<8x8x128xf32, #tpu.memory_space<vmem>>, vector<1x8x128xf32>
    %63 = vector.shape_cast %62 : vector<1x8x128xf32> to vector<8x128xf32>
    %64 = vector.shape_cast %60 : vector<8x128xf32> to vector<1x8x128xf32>
    tpu.vector_store %arg6[%61, %c0_30, %c0_31], %64 {strides = array<i32>} : memref<8x8x128xf32, #tpu.memory_space<vmem>>, vector<1x8x128xf32>,
    %c6_i32 = arith.constant 6 : i32
    %65 = arith.index_cast %c6_i32 : i32 to index
    %c0_32 = arith.constant 0 : index
    %c0_33 = arith.constant 0 : index
    %66 = vector.load %arg6[%65, %c0_32, %c0_33] : memref<8x8x128xf32, #tpu.memory_space<vmem>>, vector<1x8x128xf32>
    %67 = vector.shape_cast %66 : vector<1x8x128xf32> to vector<8x128xf32>
    %cst_34 = arith.constant dense<0.000000e+00> : vector<8x128xf32>
    %68 = tpu.matmul %60, %3, %cst_34 {dimension_numbers = #tpu.dot_dimension_numbers<[1], [0], [0], [1], [0, 0, 1, 1], [], []>} : vector<8x128xf32>, vector<128x128xf32>, vector<8x128xf32> -> vector<8x128xf32>
    %69 = arith.addf %67, %68 : vector<8x128xf32>
    %70 = math.tanh %69 : vector<8x128xf32>
    %71 = arith.index_cast %c6_i32 : i32 to index
    %c0_35 = arith.constant 0 : index
    %c0_36 = arith.constant 0 : index
    %72 = vector.load %arg6[%71, %c0_35, %c0_36] : memref<8x8x128xf32, #tpu.memory_space<vmem>>, vector<1x8x128xf32>
    %73 = vector.shape_cast %72 : vector<1x8x128xf32> to vector<8x128xf32>
    %74 = vector.shape_cast %70 : vector<8x128xf32> to vector<1x8x128xf32>
    tpu.vector_store %arg6[%71, %c0_35, %c0_36], %74 {strides = array<i32>} : memref<8x8x128xf32, #tpu.memory_space<vmem>>, vector<1x8x128xf32>,
    %c7_i32 = arith.constant 7 : i32
    %75 = arith.index_cast %c7_i32 : i32 to index
    %c0_37 = arith.constant 0 : index
    %c0_38 = arith.constant 0 : index
    %76 = vector.load %arg6[%75, %c0_37, %c0_38] : memref<8x8x128xf32, #tpu.memory_space<vmem>>, vector<1x8x128xf32>
    %77 = vector.shape_cast %76 : vector<1x8x128xf32> to vector<8x128xf32>
    %cst_39 = arith.constant dense<0.000000e+00> : vector<8x128xf32>
    %78 = tpu.matmul %70, %3, %cst_39 {dimension_numbers = #tpu.dot_dimension_numbers<[1], [0], [0], [1], [0, 0, 1, 1], [], []>} : vector<8x128xf32>, vector<128x128xf32>, vector<8x128xf32> -> vector<8x128xf32>
    %79 = arith.addf %77, %78 : vector<8x128xf32>
    %80 = math.tanh %79 : vector<8x128xf32>
    %81 = arith.index_cast %c7_i32 : i32 to index
    %c0_40 = arith.constant 0 : index
    %c0_41 = arith.constant 0 : index
    %82 = vector.load %arg6[%81, %c0_40, %c0_41] : memref<8x8x128xf32, #tpu.memory_space<vmem>>, vector<1x8x128xf32>
    %83 = vector.shape_cast %82 : vector<1x8x128xf32> to vector<8x128xf32>
    %84 = vector.shape_cast %80 : vector<8x128xf32> to vector<1x8x128xf32>
    tpu.vector_store %arg6[%81, %c0_40, %c0_41], %84 {strides = array<i32>} : memref<8x8x128xf32, #tpu.memory_space<vmem>>, vector<1x8x128xf32>,
    %c8_i32_42 = arith.constant 8 : i32
    %c1 = arith.constant 1 : index
    %c0_43 = arith.constant 0 : index
    %c0_44 = arith.constant 0 : index
    %85 = vector.load %arg2[%c1, %c0_43, %c0_44] : memref<2x128x128xf32, #tpu.memory_space<vmem>>, vector<1x128x128xf32>
    %86 = vector.shape_cast %85 : vector<1x128x128xf32> to vector<128x128xf32>
    %c1_45 = arith.constant 1 : index
    %c0_46 = arith.constant 0 : index
    %c0_47 = arith.constant 0 : index
    %87 = vector.load %arg4[%c1_45, %c0_46, %c0_47] : memref<2x1x128xf32, #tpu.memory_space<vmem>>, vector<1x1x128xf32>
    %88 = vector.shape_cast %87 : vector<1x1x128xf32> to vector<1x128xf32>
    %c0_48 = arith.constant 0 : index
    %c0_49 = arith.constant 0 : index
    %c0_50 = arith.constant 0 : index
    %89 = vector.load %arg6[%c0_48, %c0_49, %c0_50] : memref<8x8x128xf32, #tpu.memory_space<vmem>>, vector<8x8x128xf32>
    %90 = vector.shape_cast %89 : vector<8x8x128xf32> to vector<64x128xf32>
    %cst_51 = arith.constant dense<0.000000e+00> : vector<64x128xf32>
    %91 = tpu.matmul %90, %86, %cst_51 {dimension_numbers = #tpu.dot_dimension_numbers<[1], [0], [0], [1], [0, 0, 1, 1], [], []>} : vector<64x128xf32>, vector<128x128xf32>, vector<64x128xf32> -> vector<64x128xf32>
    %92 = vector.broadcast %88 : vector<1x128xf32> to vector<64x128xf32>
    %93 = arith.addf %91, %92 : vector<64x128xf32>
    %94 = vector.shape_cast %93 : vector<64x128xf32> to vector<8x8x128xf32>
    %c0_52 = arith.constant 0 : index
    %c0_53 = arith.constant 0 : index
    %c0_54 = arith.constant 0 : index
    %95 = vector.load %arg6[%c0_52, %c0_53, %c0_54] : memref<8x8x128xf32, #tpu.memory_space<vmem>>, vector<8x8x128xf32>
    tpu.vector_store %arg6[%c0_52, %c0_53, %c0_54], %94 {strides = array<i32>} : memref<8x8x128xf32, #tpu.memory_space<vmem>>, vector<8x8x128xf32>,
    %c1_55 = arith.constant 1 : index
    %c0_56 = arith.constant 0 : index
    %c0_57 = arith.constant 0 : index
    %96 = vector.load %arg3[%c1_55, %c0_56, %c0_57] : memref<2x128x128xf32, #tpu.memory_space<vmem>>, vector<1x128x128xf32>
    %97 = vector.shape_cast %96 : vector<1x128x128xf32> to vector<128x128xf32>
    %cst_58 = arith.constant 0.000000e+00 : f32
    %98 = vector.broadcast %cst_58 : f32 to vector<8x128xf32>
    %c0_i32_59 = arith.constant 0 : i32
    %99 = arith.index_cast %c0_i32_59 : i32 to index
    %c0_60 = arith.constant 0 : index
    %c0_61 = arith.constant 0 : index
    %100 = vector.load %arg6[%99, %c0_60, %c0_61] : memref<8x8x128xf32, #tpu.memory_space<vmem>>, vector<1x8x128xf32>
    %101 = vector.shape_cast %100 : vector<1x8x128xf32> to vector<8x128xf32>
    %cst_62 = arith.constant dense<0.000000e+00> : vector<8x128xf32>
    %102 = tpu.matmul %98, %97, %cst_62 {dimension_numbers = #tpu.dot_dimension_numbers<[1], [0], [0], [1], [0, 0, 1, 1], [], []>} : vector<8x128xf32>, vector<128x128xf32>, vector<8x128xf32> -> vector<8x128xf32>
    %103 = arith.addf %101, %102 : vector<8x128xf32>
    %104 = math.tanh %103 : vector<8x128xf32>
    %105 = arith.index_cast %c0_i32_59 : i32 to index
    %c0_63 = arith.constant 0 : index
    %c0_64 = arith.constant 0 : index
    %106 = vector.load %arg6[%105, %c0_63, %c0_64] : memref<8x8x128xf32, #tpu.memory_space<vmem>>, vector<1x8x128xf32>
    %107 = vector.shape_cast %106 : vector<1x8x128xf32> to vector<8x128xf32>
    %108 = vector.shape_cast %104 : vector<8x128xf32> to vector<1x8x128xf32>
    tpu.vector_store %arg6[%105, %c0_63, %c0_64], %108 {strides = array<i32>} : memref<8x8x128xf32, #tpu.memory_space<vmem>>, vector<1x8x128xf32>,
    %c1_i32_65 = arith.constant 1 : i32
    %109 = arith.index_cast %c1_i32_65 : i32 to index
    %c0_66 = arith.constant 0 : index
    %c0_67 = arith.constant 0 : index
    %110 = vector.load %arg6[%109, %c0_66, %c0_67] : memref<8x8x128xf32, #tpu.memory_space<vmem>>, vector<1x8x128xf32>
    %111 = vector.shape_cast %110 : vector<1x8x128xf32> to vector<8x128xf32>
    %cst_68 = arith.constant dense<0.000000e+00> : vector<8x128xf32>
    %112 = tpu.matmul %104, %97, %cst_68 {dimension_numbers = #tpu.dot_dimension_numbers<[1], [0], [0], [1], [0, 0, 1, 1], [], []>} : vector<8x128xf32>, vector<128x128xf32>, vector<8x128xf32> -> vector<8x128xf32>
    %113 = arith.addf %111, %112 : vector<8x128xf32>
    %114 = math.tanh %113 : vector<8x128xf32>
    %115 = arith.index_cast %c1_i32_65 : i32 to index
    %c0_69 = arith.constant 0 : index
    %c0_70 = arith.constant 0 : index
    %116 = vector.load %arg6[%115, %c0_69, %c0_70] : memref<8x8x128xf32, #tpu.memory_space<vmem>>, vector<1x8x128xf32>
    %117 = vector.shape_cast %116 : vector<1x8x128xf32> to vector<8x128xf32>
    %118 = vector.shape_cast %114 : vector<8x128xf32> to vector<1x8x128xf32>
    tpu.vector_store %arg6[%115, %c0_69, %c0_70], %118 {strides = array<i32>} : memref<8x8x128xf32, #tpu.memory_space<vmem>>, vector<1x8x128xf32>,
    %c2_i32_71 = arith.constant 2 : i32
    %119 = arith.index_cast %c2_i32_71 : i32 to index
    %c0_72 = arith.constant 0 : index
    %c0_73 = arith.constant 0 : index
    %120 = vector.load %arg6[%119, %c0_72, %c0_73] : memref<8x8x128xf32, #tpu.memory_space<vmem>>, vector<1x8x128xf32>
    %121 = vector.shape_cast %120 : vector<1x8x128xf32> to vector<8x128xf32>
    %cst_74 = arith.constant dense<0.000000e+00> : vector<8x128xf32>
    %122 = tpu.matmul %114, %97, %cst_74 {dimension_numbers = #tpu.dot_dimension_numbers<[1], [0], [0], [1], [0, 0, 1, 1], [], []>} : vector<8x128xf32>, vector<128x128xf32>, vector<8x128xf32> -> vector<8x128xf32>
    %123 = arith.addf %121, %122 : vector<8x128xf32>
    %124 = math.tanh %123 : vector<8x128xf32>
    %125 = arith.index_cast %c2_i32_71 : i32 to index
    %c0_75 = arith.constant 0 : index
    %c0_76 = arith.constant 0 : index
    %126 = vector.load %arg6[%125, %c0_75, %c0_76] : memref<8x8x128xf32, #tpu.memory_space<vmem>>, vector<1x8x128xf32>
    %127 = vector.shape_cast %126 : vector<1x8x128xf32> to vector<8x128xf32>
    %128 = vector.shape_cast %124 : vector<8x128xf32> to vector<1x8x128xf32>
    tpu.vector_store %arg6[%125, %c0_75, %c0_76], %128 {strides = array<i32>} : memref<8x8x128xf32, #tpu.memory_space<vmem>>, vector<1x8x128xf32>,
    %c3_i32_77 = arith.constant 3 : i32
    %129 = arith.index_cast %c3_i32_77 : i32 to index
    %c0_78 = arith.constant 0 : index
    %c0_79 = arith.constant 0 : index
    %130 = vector.load %arg6[%129, %c0_78, %c0_79] : memref<8x8x128xf32, #tpu.memory_space<vmem>>, vector<1x8x128xf32>
    %131 = vector.shape_cast %130 : vector<1x8x128xf32> to vector<8x128xf32>
    %cst_80 = arith.constant dense<0.000000e+00> : vector<8x128xf32>
    %132 = tpu.matmul %124, %97, %cst_80 {dimension_numbers = #tpu.dot_dimension_numbers<[1], [0], [0], [1], [0, 0, 1, 1], [], []>} : vector<8x128xf32>, vector<128x128xf32>, vector<8x128xf32> -> vector<8x128xf32>
    %133 = arith.addf %131, %132 : vector<8x128xf32>
    %134 = math.tanh %133 : vector<8x128xf32>
    %135 = arith.index_cast %c3_i32_77 : i32 to index
    %c0_81 = arith.constant 0 : index
    %c0_82 = arith.constant 0 : index
    %136 = vector.load %arg6[%135, %c0_81, %c0_82] : memref<8x8x128xf32, #tpu.memory_space<vmem>>, vector<1x8x128xf32>
    %137 = vector.shape_cast %136 : vector<1x8x128xf32> to vector<8x128xf32>
    %138 = vector.shape_cast %134 : vector<8x128xf32> to vector<1x8x128xf32>
    tpu.vector_store %arg6[%135, %c0_81, %c0_82], %138 {strides = array<i32>} : memref<8x8x128xf32, #tpu.memory_space<vmem>>, vector<1x8x128xf32>,
    %c4_i32_83 = arith.constant 4 : i32
    %139 = arith.index_cast %c4_i32_83 : i32 to index
    %c0_84 = arith.constant 0 : index
    %c0_85 = arith.constant 0 : index
    %140 = vector.load %arg6[%139, %c0_84, %c0_85] : memref<8x8x128xf32, #tpu.memory_space<vmem>>, vector<1x8x128xf32>
    %141 = vector.shape_cast %140 : vector<1x8x128xf32> to vector<8x128xf32>
    %cst_86 = arith.constant dense<0.000000e+00> : vector<8x128xf32>
    %142 = tpu.matmul %134, %97, %cst_86 {dimension_numbers = #tpu.dot_dimension_numbers<[1], [0], [0], [1], [0, 0, 1, 1], [], []>} : vector<8x128xf32>, vector<128x128xf32>, vector<8x128xf32> -> vector<8x128xf32>
    %143 = arith.addf %141, %142 : vector<8x128xf32>
    %144 = math.tanh %143 : vector<8x128xf32>
    %145 = arith.index_cast %c4_i32_83 : i32 to index
    %c0_87 = arith.constant 0 : index
    %c0_88 = arith.constant 0 : index
    %146 = vector.load %arg6[%145, %c0_87, %c0_88] : memref<8x8x128xf32, #tpu.memory_space<vmem>>, vector<1x8x128xf32>
    %147 = vector.shape_cast %146 : vector<1x8x128xf32> to vector<8x128xf32>
    %148 = vector.shape_cast %144 : vector<8x128xf32> to vector<1x8x128xf32>
    tpu.vector_store %arg6[%145, %c0_87, %c0_88], %148 {strides = array<i32>} : memref<8x8x128xf32, #tpu.memory_space<vmem>>, vector<1x8x128xf32>,
    %c5_i32_89 = arith.constant 5 : i32
    %149 = arith.index_cast %c5_i32_89 : i32 to index
    %c0_90 = arith.constant 0 : index
    %c0_91 = arith.constant 0 : index
    %150 = vector.load %arg6[%149, %c0_90, %c0_91] : memref<8x8x128xf32, #tpu.memory_space<vmem>>, vector<1x8x128xf32>
    %151 = vector.shape_cast %150 : vector<1x8x128xf32> to vector<8x128xf32>
    %cst_92 = arith.constant dense<0.000000e+00> : vector<8x128xf32>
    %152 = tpu.matmul %144, %97, %cst_92 {dimension_numbers = #tpu.dot_dimension_numbers<[1], [0], [0], [1], [0, 0, 1, 1], [], []>} : vector<8x128xf32>, vector<128x128xf32>, vector<8x128xf32> -> vector<8x128xf32>
    %153 = arith.addf %151, %152 : vector<8x128xf32>
    %154 = math.tanh %153 : vector<8x128xf32>
    %155 = arith.index_cast %c5_i32_89 : i32 to index
    %c0_93 = arith.constant 0 : index
    %c0_94 = arith.constant 0 : index
    %156 = vector.load %arg6[%155, %c0_93, %c0_94] : memref<8x8x128xf32, #tpu.memory_space<vmem>>, vector<1x8x128xf32>
    %157 = vector.shape_cast %156 : vector<1x8x128xf32> to vector<8x128xf32>
    %158 = vector.shape_cast %154 : vector<8x128xf32> to vector<1x8x128xf32>
    tpu.vector_store %arg6[%155, %c0_93, %c0_94], %158 {strides = array<i32>} : memref<8x8x128xf32, #tpu.memory_space<vmem>>, vector<1x8x128xf32>,
    %c6_i32_95 = arith.constant 6 : i32
    %159 = arith.index_cast %c6_i32_95 : i32 to index
    %c0_96 = arith.constant 0 : index
    %c0_97 = arith.constant 0 : index
    %160 = vector.load %arg6[%159, %c0_96, %c0_97] : memref<8x8x128xf32, #tpu.memory_space<vmem>>, vector<1x8x128xf32>
    %161 = vector.shape_cast %160 : vector<1x8x128xf32> to vector<8x128xf32>
    %cst_98 = arith.constant dense<0.000000e+00> : vector<8x128xf32>
    %162 = tpu.matmul %154, %97, %cst_98 {dimension_numbers = #tpu.dot_dimension_numbers<[1], [0], [0], [1], [0, 0, 1, 1], [], []>} : vector<8x128xf32>, vector<128x128xf32>, vector<8x128xf32> -> vector<8x128xf32>
    %163 = arith.addf %161, %162 : vector<8x128xf32>
    %164 = math.tanh %163 : vector<8x128xf32>
    %165 = arith.index_cast %c6_i32_95 : i32 to index
    %c0_99 = arith.constant 0 : index
    %c0_100 = arith.constant 0 : index
    %166 = vector.load %arg6[%165, %c0_99, %c0_100] : memref<8x8x128xf32, #tpu.memory_space<vmem>>, vector<1x8x128xf32>
    %167 = vector.shape_cast %166 : vector<1x8x128xf32> to vector<8x128xf32>
    %168 = vector.shape_cast %164 : vector<8x128xf32> to vector<1x8x128xf32>
    tpu.vector_store %arg6[%165, %c0_99, %c0_100], %168 {strides = array<i32>} : memref<8x8x128xf32, #tpu.memory_space<vmem>>, vector<1x8x128xf32>,
    %c7_i32_101 = arith.constant 7 : i32
    %169 = arith.index_cast %c7_i32_101 : i32 to index
    %c0_102 = arith.constant 0 : index
    %c0_103 = arith.constant 0 : index
    %170 = vector.load %arg6[%169, %c0_102, %c0_103] : memref<8x8x128xf32, #tpu.memory_space<vmem>>, vector<1x8x128xf32>
    %171 = vector.shape_cast %170 : vector<1x8x128xf32> to vector<8x128xf32>
    %cst_104 = arith.constant dense<0.000000e+00> : vector<8x128xf32>
    %172 = tpu.matmul %164, %97, %cst_104 {dimension_numbers = #tpu.dot_dimension_numbers<[1], [0], [0], [1], [0, 0, 1, 1], [], []>} : vector<8x128xf32>, vector<128x128xf32>, vector<8x128xf32> -> vector<8x128xf32>
    %173 = arith.addf %171, %172 : vector<8x128xf32>
    %174 = math.tanh %173 : vector<8x128xf32>
    %175 = arith.index_cast %c7_i32_101 : i32 to index
    %c0_105 = arith.constant 0 : index
    %c0_106 = arith.constant 0 : index
    %176 = vector.load %arg6[%175, %c0_105, %c0_106] : memref<8x8x128xf32, #tpu.memory_space<vmem>>, vector<1x8x128xf32>
    %177 = vector.shape_cast %176 : vector<1x8x128xf32> to vector<8x128xf32>
    %178 = vector.shape_cast %174 : vector<8x128xf32> to vector<1x8x128xf32>
    tpu.vector_store %arg6[%175, %c0_105, %c0_106], %178 {strides = array<i32>} : memref<8x8x128xf32, #tpu.memory_space<vmem>>, vector<1x8x128xf32>,
    %c8_i32_107 = arith.constant 8 : i32
    "tpu.region"() ({
      %179 = tpu.sem_alloc : memref<!tpu.dma_semaphore, #tpu.memory_space<semaphore_mem>>
      %c0_i32_108 = arith.constant 0 : i32
      %c0_i32_109 = arith.constant 0 : i32
      %180 = tpu.memref_slice %arg5[%c0_i32_108, %1, %c0_i32_109] : memref<8x8x128xf32, #tpu.memory_space<any>> -> memref<8x8x128xf32, #tpu.memory_space<any>>
      tpu.enqueue_dma source(%arg6 : memref<8x8x128xf32, #tpu.memory_space<vmem>>) target(%180 : memref<8x8x128xf32, #tpu.memory_space<any>>) target_semaphore(%179 : memref<!tpu.dma_semaphore, #tpu.memory_space<semaphore_mem>>)
      %c0_i32_110 = arith.constant 0 : i32
      %c0_i32_111 = arith.constant 0 : i32
      %181 = tpu.memref_slice %arg5[%c0_i32_110, %1, %c0_i32_111] : memref<8x8x128xf32, #tpu.memory_space<any>> -> memref<8x8x128xf32, #tpu.memory_space<any>>
      tpu.wait_dma2 semaphore(%179 : memref<!tpu.dma_semaphore, #tpu.memory_space<semaphore_mem>>) src(%arg6 : memref<8x8x128xf32, #tpu.memory_space<vmem>>) dst(%181 : memref<8x8x128xf32, #tpu.memory_space<any>>)
      tpu.yield
    }) : () -> ()
    return
  }
  func.func @transform_1(%arg0: i32) -> (i32, i32, i32) {
    %c0_i32 = arith.constant 0 : i32
    %c0_i32_0 = arith.constant 0 : i32
    %c0_i32_1 = arith.constant 0 : i32
    %c0_i32_2 = arith.constant 0 : i32
    return %c0_i32, %c0_i32_0, %c0_i32_1 : i32, i32, i32
  }
  func.func @transform_2(%arg0: i32) -> (i32, i32, i32) {
    %c0_i32 = arith.constant 0 : i32
    %c0_i32_0 = arith.constant 0 : i32
    %c0_i32_1 = arith.constant 0 : i32
    %c0_i32_2 = arith.constant 0 : i32
    return %c0_i32, %c0_i32_0, %c0_i32_1 : i32, i32, i32
  }
  func.func @transform_3(%arg0: i32) -> (i32, i32, i32) {
    %c0_i32 = arith.constant 0 : i32
    %c0_i32_0 = arith.constant 0 : i32
    %c0_i32_1 = arith.constant 0 : i32
    %c0_i32_2 = arith.constant 0 : i32
    return %c0_i32, %c0_i32_0, %c0_i32_1 : i32, i32, i32
  }
}

</mosaic_0001>

<bundles_post_ra>
// kernel: rnn_dynamics_forward.1
= control target key start
LH: loop header
LB: loop body
LE: loop exit
PB: predicated region body
PF: predicated region fallthrough
CT: control target
= control target key end

     0   :  { %s3549_s0 = inlined_call_operand.vmem [shape: f32[8,8,128], index: 0, kind: input, shape index: {}, may-alias: {0,4}]   ;;  %s3550_s1 = inlined_call_operand.vmem [shape: f32[2,128,128], index: 1, kind: input, shape index: {}]   ;;  %s3551_s2 = inlined_call_operand.vmem [shape: f32[2,128,128], index: 2, kind: input, shape index: {}]   ;;  %s3552_s3 = inlined_call_operand.vmem [shape: f32[2,1,128], index: 3, kind: input, shape index: {}]   ;;  %s3553_s4 = inlined_call_operand.vmem [shape: f32[8,8,128], index: 4, kind: output, shape index: {}, may-alias: {0,4}]  }
   0x1   :  { %v2944_v0 = vld [vmem:[%s3549_s0] sm:$0xff]  ;;  %v2949_v1 = vld [vmem:[%s3549_s0 + $0x8] sm:$0xff]  ;;  %v2954_v2 = vld [vmem:[%s3549_s0 + $0x10] sm:$0xff] }
   0x2   :  { %v2959_v3 = vld [vmem:[%s3549_s0 + $0x18] sm:$0xff]  ;;  %v2964_v4 = vld [vmem:[%s3549_s0 + $0x20] sm:$0xff]  ;;  %v2969_v5 = vld [vmem:[%s3549_s0 + $0x28] sm:$0xff] }
   0x3   :  { %v2974_v6 = vld [vmem:[%s3549_s0 + $0x30] sm:$0xff]  ;;  %v2979_v7 = vld [vmem:[%s3549_s0 + $0x38] sm:$0xff] }
   0x4   :  { %72 = vsyncadd [#allocation3], 1024 }
   0x5   :  { %2909 = dma.done.wait [#allocation3], 1024 }
   0x6   :  { %2910 = vsyncadd [#allocation3], 4294966272  ;;  %v77_v8 = vld [vmem:[%s3551_s2] sm:$0xff]  ;;  %v78_v9 = vld [vmem:[%s3551_s2 + $0x8] sm:$0xff]  ;;  %v2913_v11 = vmov 0.0|0.0   ;;  %vm2914_vm0 = vmmov 0  }
   0x7   :  { %v79_v10 = vld [vmem:[%s3551_s2 + $0x10] sm:$0xff]  ;;  %2458 = vmatprep.subr.bf16.mxu0 %v2913_v11  ;;  %v2991_v12 = vpack.c.bf16 %v78_v9, %v77_v8  ;;  %v80_v13 = vld [vmem:[%s3551_s2 + $0x18] sm:$0xff]  ;;  %v2915_v14 = vmov 0.0   ;;  %2482 = vmatprep.subr.bf16.mxu1 %v2913_v11  ;;  %v81_v16 = vld [vmem:[%s3551_s2 + $0x20] sm:$0xff] }
   0x8   :  { %1886 = vmatprep.mubr.msk.f32.mxu0 %vm2914_vm0, %v2915_v14  ;;  %1921 = vmatprep.mubr.msk.f32.mxu1 %vm2914_vm0, %v2915_v14  ;;  %v3002_v15 = vpack.c.bf16 %v80_v13, %v79_v10  ;;  %v82_v17 = vld [vmem:[%s3551_s2 + $0x28] sm:$0xff]  ;;  %v83_v19 = vld [vmem:[%s3551_s2 + $0x30] sm:$0xff]  ;;  %v84_v20 = vld [vmem:[%s3551_s2 + $0x38] sm:$0xff] }
   0x9   :  { %2460 = vmatpush3.bf16.msra.mxu0 %v2991_v12  ;;  %2484 = vmatpush3.bf16.msra.mxu1 %v2991_v12  ;;  %v3014_v18 = vpack.c.bf16 %v82_v17, %v81_v16  ;;  %v3026_v21 = vpack.c.bf16 %v84_v20, %v83_v19  ;;  %v85_v22 = vld [vmem:[%s3551_s2 + $0x40] sm:$0xff]  ;;  %v86_v23 = vld [vmem:[%s3551_s2 + $0x48] sm:$0xff]  ;;  %v87_v25 = vld [vmem:[%s3551_s2 + $0x50] sm:$0xff] }
   0xa   :  { %2461 = vmatprep.subr.bf16.mxu0 %v2913_v11  ;;  %2485 = vmatprep.subr.bf16.mxu1 %v2913_v11  ;;  %v3038_v24 = vpack.c.bf16 %v86_v23, %v85_v22  ;;  %v88_v26 = vld [vmem:[%s3551_s2 + $0x58] sm:$0xff]  ;;  %v89_v28 = vld [vmem:[%s3551_s2 + $0x60] sm:$0xff]  ;;  %v90_v29 = vld [vmem:[%s3551_s2 + $0x68] sm:$0xff] }
   0xb   :  { %v3050_v27 = vpack.c.bf16 %v88_v26, %v87_v25  ;;  %v3062_v30 = vpack.c.bf16 %v90_v29, %v89_v28  ;;  %v91_v31 = vld [vmem:[%s3551_s2 + $0x70] sm:$0xff]  ;;  %v92_v32 = vld [vmem:[%s3551_s2 + $0x78] sm:$0xff]  ;;  %v1524_v54 = vld [vmem:[%s3550_s1 + $0x80] sm:$0xff] }
   0xc   :  { %v3074_v33 = vpack.c.bf16 %v92_v32, %v91_v31  ;;  %v1525_v55 = vld [vmem:[%s3550_s1 + $0x88] sm:$0xff]  ;;  %v1526_v60 = vld [vmem:[%s3550_s1 + $0x90] sm:$0xff]  ;;  %v1527_v61 = vld [vmem:[%s3550_s1 + $0x98] sm:$0xff] }
   0xd   :  { %2463 = vmatpush3.bf16.msra.mxu0 %v3002_v15  ;;  %2487 = vmatpush3.bf16.msra.mxu1 %v3002_v15  ;;  %v2650_v56 = vpack.c.bf16 %v1525_v55, %v1524_v54  ;;  %v2654_v62 = vpack.c.bf16 %v1527_v61, %v1526_v60  ;;  %v1532_v8 = vld [vmem:[%s3550_s1 + $0xc0] sm:$0xff]  ;;  %v1533_v9 = vld [vmem:[%s3550_s1 + $0xc8] sm:$0xff]  ;;  %v1535_v13 = vld [vmem:[%s3550_s1 + $0xd8] sm:$0xff] }
   0xe   :  { %2464 = vmatprep.subr.bf16.mxu0 %v2913_v11  ;;  %2488 = vmatprep.subr.bf16.mxu1 %v2913_v11  ;;  %v2666_v10 = vpack.c.bf16 %v1533_v9, %v1532_v8  ;;  %v1536_v16 = vld [vmem:[%s3550_s1 + $0xe0] sm:$0xff]  ;;  %v1537_v17 = vld [vmem:[%s3550_s1 + $0xe8] sm:$0xff]  ;;  %v1538_v19 = vld [vmem:[%s3550_s1 + $0xf0] sm:$0xff] }
   0xf   :  { %v1539_v20 = vld [vmem:[%s3550_s1 + $0xf8] sm:$0xff]  ;;  %v1542_v22 = vld [vmem:[%s3551_s2 + $0x80] sm:$0xff]  ;;  %v1543_v23 = vld [vmem:[%s3551_s2 + $0x88] sm:$0xff] }
  0x10   :  { %v1544_v25 = vld [vmem:[%s3551_s2 + $0x90] sm:$0xff]  ;;  %v1545_v26 = vld [vmem:[%s3551_s2 + $0x98] sm:$0xff]  ;;  %v1546_v28 = vld [vmem:[%s3551_s2 + $0xa0] sm:$0xff] }
  0x11   :  { %2466 = vmatpush3.bf16.msra.mxu0 %v3014_v18  ;;  %2490 = vmatpush3.bf16.msra.mxu1 %v3014_v18  ;;  %v1547_v29 = vld [vmem:[%s3551_s2 + $0xa8] sm:$0xff]  ;;  %v1548_v31 = vld [vmem:[%s3551_s2 + $0xb0] sm:$0xff]  ;;  %v1549_v32 = vld [vmem:[%s3551_s2 + $0xb8] sm:$0xff] }
  0x12   :  { %2467 = vmatprep.subr.bf16.mxu0 %v2913_v11  ;;  %2491 = vmatprep.subr.bf16.mxu1 %v2913_v11 }
  0x15   :  { %2469 = vmatpush3.bf16.msra.mxu0 %v3026_v21  ;;  %2493 = vmatpush3.bf16.msra.mxu1 %v3026_v21 }
  0x16   :  { %2470 = vmatprep.subr.bf16.mxu0 %v2913_v11  ;;  %2494 = vmatprep.subr.bf16.mxu1 %v2913_v11 }
  0x19   :  { %2472 = vmatpush3.bf16.msra.mxu0 %v3038_v24  ;;  %2496 = vmatpush3.bf16.msra.mxu1 %v3038_v24 }
  0x1a   :  { %2473 = vmatprep.subr.bf16.mxu0 %v2913_v11  ;;  %2497 = vmatprep.subr.bf16.mxu1 %v2913_v11 }
  0x1d   :  { %2475 = vmatpush3.bf16.msra.mxu0 %v3050_v27  ;;  %2499 = vmatpush3.bf16.msra.mxu1 %v3050_v27 }
  0x1e   :  { %2476 = vmatprep.subr.bf16.mxu0 %v2913_v11  ;;  %2500 = vmatprep.subr.bf16.mxu1 %v2913_v11 }
  0x21   :  { %2478 = vmatpush3.bf16.msra.mxu0 %v3062_v30  ;;  %2502 = vmatpush3.bf16.msra.mxu1 %v3062_v30 }
  0x22   :  { %2479 = vmatprep.subr.bf16.mxu0 %v2913_v11  ;;  %2503 = vmatprep.subr.bf16.mxu1 %v2913_v11 }
  0x25   :  { %2481 = vmatpush3.bf16.msra.mxu0 %v3074_v33  ;;  %2505 = vmatpush3.bf16.msra.mxu1 %v3074_v33 }
  0x26   :  { %2506 = vmatprep.subr.bf16.mxu0 %v2913_v11  ;;  %2530 = vmatprep.subr.bf16.mxu1 %v2913_v11 }
  0x28   :  { %1887 = vmatmul.mubr.f32.vlgmr.msra.gmra.mrb[0].mxu0 %v2915_v14 }
  0x29   :  { %2508 = vmatpush3.bf16.msra.mxu0 %v2991_v12  ;;  %1956 = vmatprep.mubr.msk.f32.mxu0 %vm2914_vm0, %v2915_v14 }
  0x2a   :  { %2509 = vmatprep.subr.bf16.mxu0 %v2913_v11 }
  0x2d   :  { %2511 = vmatpush3.bf16.msra.mxu0 %v3002_v15 }
  0x2e   :  { %2512 = vmatprep.subr.bf16.mxu0 %v2913_v11 }
  0x31   :  { %2514 = vmatpush3.bf16.msra.mxu0 %v3014_v18 }
  0x32   :  { %2515 = vmatprep.subr.bf16.mxu0 %v2913_v11 }
  0x35   :  { %2517 = vmatpush3.bf16.msra.mxu0 %v3026_v21 }
  0x36   :  { %2518 = vmatprep.subr.bf16.mxu0 %v2913_v11 }
  0x39   :  { %2520 = vmatpush3.bf16.msra.mxu0 %v3038_v24 }
  0x3a   :  { %2521 = vmatprep.subr.bf16.mxu0 %v2913_v11 }
  0x3d   :  { %2523 = vmatpush3.bf16.msra.mxu0 %v3050_v27 }
  0x3e   :  { %2524 = vmatprep.subr.bf16.mxu0 %v2913_v11 }
  0x41   :  { %2526 = vmatpush3.bf16.msra.mxu0 %v3062_v30 }
  0x42   :  { %2527 = vmatprep.subr.bf16.mxu0 %v2913_v11 }
  0x45   :  { %2529 = vmatpush3.bf16.msra.mxu0 %v3074_v33 }
  0x46   :  { %2554 = vmatprep.subr.bf16.mxu0 %v2913_v11 }
  0xfb   :  { %v160_v34 = vpop.f32.mrb[0].mxu0 }
  0xfc   :  { %v164_v35 = vadd.f32 %v160_v34, %v2944_v0  ;;  %v1888_v36 = vpop.f32.mrb[1].mxu0  ;;  %v1528_v0 = vld [vmem:[%s3550_s1 + $0xa0] sm:$0xff] }
  0xfd   :  { %v1550_v34 = vld [vmem:[%s3551_s2 + $0xc0] sm:$0xff] }
  0xfe   :  { %2877 = vtanh.f32 %v164_v35  ;;  %v1551_v35 = vld [vmem:[%s3551_s2 + $0xc8] sm:$0xff] }
  0xff   :  { %v3312_v36 = vpack.c.bf16 %v1551_v35, %v1550_v34 }
 0x108   :  { %v3103_v37 = vpop.eup %2877 }
 0x109   :  { %1922 = vmatmul.mubr.f32.vlgmr.msra.gmra.mrb[0].mxu1 %v3103_v37 }
 0x10a   :  { %2532 = vmatpush3.bf16.msra.mxu1 %v2991_v12  ;;  %1991 = vmatprep.mubr.msk.f32.mxu1 %vm2914_vm0, %v2915_v14 }
 0x10b   :  { %2533 = vmatprep.subr.bf16.mxu1 %v2913_v11 }
 0x10e   :  { %2535 = vmatpush3.bf16.msra.mxu1 %v3002_v15 }
 0x10f   :  { %2536 = vmatprep.subr.bf16.mxu1 %v2913_v11 }
 0x112   :  { %2538 = vmatpush3.bf16.msra.mxu1 %v3014_v18 }
 0x113   :  { %2539 = vmatprep.subr.bf16.mxu1 %v2913_v11 }
 0x116   :  { %2541 = vmatpush3.bf16.msra.mxu1 %v3026_v21 }
 0x117   :  { %2542 = vmatprep.subr.bf16.mxu1 %v2913_v11 }
 0x11a   :  { %2544 = vmatpush3.bf16.msra.mxu1 %v3038_v24 }
 0x11b   :  { %2545 = vmatprep.subr.bf16.mxu1 %v2913_v11 }
 0x11e   :  { %2547 = vmatpush3.bf16.msra.mxu1 %v3050_v27 }
 0x11f   :  { %2548 = vmatprep.subr.bf16.mxu1 %v2913_v11 }
 0x122   :  { %2550 = vmatpush3.bf16.msra.mxu1 %v3062_v30 }
 0x123   :  { %2551 = vmatprep.subr.bf16.mxu1 %v2913_v11 }
 0x126   :  { %2553 = vmatpush3.bf16.msra.mxu1 %v3074_v33 }
 0x127   :  { %2578 = vmatprep.subr.bf16.mxu1 %v2913_v11 }
 0x1dc   :  { %v235_v38 = vpop.f32.mrb[0].mxu1 }
 0x1dd   :  { %v239_v39 = vadd.f32 %v235_v38, %v2949_v1  ;;  %v1923_v40 = vpop.f32.mrb[1].mxu1  ;;  %v1529_v1 = vld [vmem:[%s3550_s1 + $0xa8] sm:$0xff]  ;;  %v1553_v38 = vld [vmem:[%s3551_s2 + $0xd8] sm:$0xff] }
 0x1de   :  { %v1554_v40 = vld [vmem:[%s3551_s2 + $0xe0] sm:$0xff] }
 0x1df   :  { %2879 = vtanh.f32 %v239_v39 }
 0x1e9   :  { %v3125_v41 = vpop.eup %2879 }
 0x1ea   :  { %1957 = vmatmul.mubr.f32.vlgmr.msra.gmra.mrb[2].mxu0 %v3125_v41 }
 0x1eb   :  { %2556 = vmatpush3.bf16.msra.mxu0 %v2991_v12  ;;  %2026 = vmatprep.mubr.msk.f32.mxu0 %vm2914_vm0, %v2915_v14 }
 0x1ec   :  { %2557 = vmatprep.subr.bf16.mxu0 %v2913_v11 }
 0x1ef   :  { %2559 = vmatpush3.bf16.msra.mxu0 %v3002_v15 }
 0x1f0   :  { %2560 = vmatprep.subr.bf16.mxu0 %v2913_v11 }
 0x1f3   :  { %2562 = vmatpush3.bf16.msra.mxu0 %v3014_v18 }
 0x1f4   :  { %2563 = vmatprep.subr.bf16.mxu0 %v2913_v11 }
 0x1f7   :  { %2565 = vmatpush3.bf16.msra.mxu0 %v3026_v21 }
 0x1f8   :  { %2566 = vmatprep.subr.bf16.mxu0 %v2913_v11 }
 0x1fb   :  { %2568 = vmatpush3.bf16.msra.mxu0 %v3038_v24 }
 0x1fc   :  { %2569 = vmatprep.subr.bf16.mxu0 %v2913_v11 }
 0x1ff   :  { %2571 = vmatpush3.bf16.msra.mxu0 %v3050_v27 }
 0x200   :  { %2572 = vmatprep.subr.bf16.mxu0 %v2913_v11 }
 0x203   :  { %2574 = vmatpush3.bf16.msra.mxu0 %v3062_v30 }
 0x204   :  { %2575 = vmatprep.subr.bf16.mxu0 %v2913_v11 }
 0x207   :  { %2577 = vmatpush3.bf16.msra.mxu0 %v3074_v33 }
 0x208   :  { %2602 = vmatprep.subr.bf16.mxu0 %v2913_v11 }
 0x2bd   :  { %v310_v42 = vpop.f32.mrb[2].mxu0 }
 0x2be   :  { %v314_v43 = vadd.f32 %v310_v42, %v2954_v2  ;;  %v1958_v44 = vpop.f32.mrb[3].mxu0  ;;  %v2658_v2 = vpack.c.bf16 %v1529_v1, %v1528_v0 }
 0x2bf   :  { %v1557_v44 = vld [vmem:[%s3551_s2 + $0xf8] sm:$0xff] }
 0x2c0   :  { %2881 = vtanh.f32 %v314_v43  ;;  %v1556_v43 = vld [vmem:[%s3551_s2 + $0xf0] sm:$0xff] }
 0x2ca   :  { %v3147_v45 = vpop.eup %2881 }
 0x2cb   :  { %1992 = vmatmul.mubr.f32.vlgmr.msra.gmra.mrb[2].mxu1 %v3147_v45 }
 0x2cc   :  { %2580 = vmatpush3.bf16.msra.mxu1 %v2991_v12  ;;  %2061 = vmatprep.mubr.msk.f32.mxu1 %vm2914_vm0, %v2915_v14 }
 0x2cd   :  { %2581 = vmatprep.subr.bf16.mxu1 %v2913_v11 }
 0x2d0   :  { %2583 = vmatpush3.bf16.msra.mxu1 %v3002_v15 }
 0x2d1   :  { %2584 = vmatprep.subr.bf16.mxu1 %v2913_v11 }
 0x2d4   :  { %2586 = vmatpush3.bf16.msra.mxu1 %v3014_v18 }
 0x2d5   :  { %2587 = vmatprep.subr.bf16.mxu1 %v2913_v11 }
 0x2d8   :  { %2589 = vmatpush3.bf16.msra.mxu1 %v3026_v21 }
 0x2d9   :  { %2590 = vmatprep.subr.bf16.mxu1 %v2913_v11 }
 0x2dc   :  { %2592 = vmatpush3.bf16.msra.mxu1 %v3038_v24 }
 0x2dd   :  { %2593 = vmatprep.subr.bf16.mxu1 %v2913_v11 }
 0x2e0   :  { %2595 = vmatpush3.bf16.msra.mxu1 %v3050_v27 }
 0x2e1   :  { %2596 = vmatprep.subr.bf16.mxu1 %v2913_v11 }
 0x2e4   :  { %2598 = vmatpush3.bf16.msra.mxu1 %v3062_v30 }
 0x2e5   :  { %2599 = vmatprep.subr.bf16.mxu1 %v2913_v11 }
 0x2e8   :  { %2601 = vmatpush3.bf16.msra.mxu1 %v3074_v33 }
 0x2e9   :  { %2626 = vmatprep.subr.bf16.mxu1 %v2913_v11 }
 0x39e   :  { %v385_v46 = vpop.f32.mrb[2].mxu1 }
 0x39f   :  { %v389_v47 = vadd.f32 %v385_v46, %v2959_v3  ;;  %v1993_v48 = vpop.f32.mrb[3].mxu1  ;;  %v1530_v3 = vld [vmem:[%s3550_s1 + $0xb0] sm:$0xff] }
 0x3a1   :  { %2883 = vtanh.f32 %v389_v47 }
 0x3ab   :  { %v3169_v49 = vpop.eup %2883 }
 0x3ac   :  { %2027 = vmatmul.mubr.f32.vlgmr.msra.gmra.mrb[4].mxu0 %v3169_v49 }
 0x3ad   :  { %2604 = vmatpush3.bf16.msra.mxu0 %v2991_v12  ;;  %2096 = vmatprep.mubr.msk.f32.mxu0 %vm2914_vm0, %v2915_v14 }
 0x3ae   :  { %2605 = vmatprep.subr.bf16.mxu0 %v2913_v11 }
 0x3b1   :  { %2607 = vmatpush3.bf16.msra.mxu0 %v3002_v15 }
 0x3b2   :  { %2608 = vmatprep.subr.bf16.mxu0 %v2913_v11 }
 0x3b5   :  { %2610 = vmatpush3.bf16.msra.mxu0 %v3014_v18 }
 0x3b6   :  { %2611 = vmatprep.subr.bf16.mxu0 %v2913_v11 }
 0x3b9   :  { %2613 = vmatpush3.bf16.msra.mxu0 %v3026_v21 }
 0x3ba   :  { %2614 = vmatprep.subr.bf16.mxu0 %v2913_v11 }
 0x3bd   :  { %2616 = vmatpush3.bf16.msra.mxu0 %v3038_v24 }
 0x3be   :  { %2617 = vmatprep.subr.bf16.mxu0 %v2913_v11 }
 0x3c1   :  { %2619 = vmatpush3.bf16.msra.mxu0 %v3050_v27 }
 0x3c2   :  { %2620 = vmatprep.subr.bf16.mxu0 %v2913_v11 }
 0x3c5   :  { %2622 = vmatpush3.bf16.msra.mxu0 %v3062_v30 }
 0x3c6   :  { %2623 = vmatprep.subr.bf16.mxu0 %v2913_v11 }
 0x3c9   :  { %2625 = vmatpush3.bf16.msra.mxu0 %v3074_v33 }
 0x3ca   :  { %2651 = vmatprep.subr.bf16.mxu0 %v2650_v56 }
 0x47f   :  { %v460_v50 = vpop.f32.mrb[4].mxu0 }
 0x480   :  { %v464_v51 = vadd.f32 %v460_v50, %v2964_v4  ;;  %v2028_v52 = vpop.f32.mrb[5].mxu0  ;;  %v1531_v4 = vld [vmem:[%s3550_s1 + $0xb8] sm:$0xff] }
 0x482   :  { %2885 = vtanh.f32 %v464_v51 }
 0x48c   :  { %v3190_v53 = vpop.eup %2885 }
 0x48d   :  { %2062 = vmatmul.mubr.f32.vlgmr.msra.gmra.mrb[4].mxu1 %v3190_v53 }
 0x48e   :  { %2628 = vmatpush3.bf16.msra.mxu1 %v2991_v12  ;;  %2131 = vmatprep.mubr.msk.f32.mxu1 %vm2914_vm0, %v2915_v14  ;;  %v1534_v12 = vld [vmem:[%s3550_s1 + $0xd0] sm:$0xff] }
 0x48f   :  { %2629 = vmatprep.subr.bf16.mxu1 %v2913_v11 }
 0x492   :  { %2631 = vmatpush3.bf16.msra.mxu1 %v3002_v15  ;;  %v2670_v15 = vpack.c.bf16 %v1535_v13, %v1534_v12 }
 0x493   :  { %2632 = vmatprep.subr.bf16.mxu1 %v2913_v11 }
 0x496   :  { %2634 = vmatpush3.bf16.msra.mxu1 %v3014_v18  ;;  %v2674_v18 = vpack.c.bf16 %v1537_v17, %v1536_v16 }
 0x497   :  { %2635 = vmatprep.subr.bf16.mxu1 %v2913_v11 }
 0x49a   :  { %2637 = vmatpush3.bf16.msra.mxu1 %v3026_v21  ;;  %v2678_v21 = vpack.c.bf16 %v1539_v20, %v1538_v19 }
 0x49b   :  { %2638 = vmatprep.subr.bf16.mxu1 %v2913_v11 }
 0x49e   :  { %2640 = vmatpush3.bf16.msra.mxu1 %v3038_v24  ;;  %v3272_v24 = vpack.c.bf16 %v1543_v23, %v1542_v22 }
 0x49f   :  { %2641 = vmatprep.subr.bf16.mxu1 %v2913_v11 }
 0x4a2   :  { %2643 = vmatpush3.bf16.msra.mxu1 %v3050_v27  ;;  %v3282_v27 = vpack.c.bf16 %v1545_v26, %v1544_v25 }
 0x4a3   :  { %2644 = vmatprep.subr.bf16.mxu1 %v2913_v11 }
 0x4a6   :  { %2646 = vmatpush3.bf16.msra.mxu1 %v3062_v30  ;;  %v3292_v30 = vpack.c.bf16 %v1547_v29, %v1546_v28 }
 0x4a7   :  { %2647 = vmatprep.subr.bf16.mxu1 %v2913_v11 }
 0x4aa   :  { %2649 = vmatpush3.bf16.msra.mxu1 %v3074_v33  ;;  %v3302_v33 = vpack.c.bf16 %v1549_v32, %v1548_v31 }
 0x4ab   :  { %2682 = vmatprep.subr.bf16.mxu1 %v2913_v11 }
 0x560   :  { %v535_v57 = vpop.f32.mrb[4].mxu1 }
 0x561   :  { %v539_v58 = vadd.f32 %v535_v57, %v2969_v5  ;;  %v2063_v59 = vpop.f32.mrb[5].mxu1  ;;  %v2662_v5 = vpack.c.bf16 %v1531_v4, %v1530_v3 }
 0x562   :  { %v3400_v59 = vld [vmem:[%s3552_s3 + $0x1] ss:$0 sm:$0xff] }
 0x563   :  { %2887 = vtanh.f32 %v539_v58 }
 0x56d   :  { %v2888_v63 = vpop.eup %2887 }
 0x56e   :  { %2097 = vmatmul.mubr.f32.vlgmr.msra.gmra.mrb[6].mxu0 %v2888_v63 }
 0x56f   :  { %2653 = vmatpush3.bf16.msra.mxu0 %v2650_v56  ;;  %2166 = vmatprep.mubr.f32.mxu0 %v3103_v37  ;;  %v1552_v37 = vld [vmem:[%s3551_s2 + $0xd0] sm:$0xff] }
 0x570   :  { %2655 = vmatprep.subr.bf16.mxu0 %v2654_v62  ;;  %v3322_v39 = vpack.c.bf16 %v1553_v38, %v1552_v37 }
 0x573   :  { %2657 = vmatpush3.bf16.msra.mxu0 %v2654_v62 }
 0x574   :  { %2659 = vmatprep.subr.bf16.mxu0 %v2658_v2 }
 0x577   :  { %2661 = vmatpush3.bf16.msra.mxu0 %v2658_v2 }
 0x578   :  { %2663 = vmatprep.subr.bf16.mxu0 %v2662_v5 }
 0x57b   :  { %2665 = vmatpush3.bf16.msra.mxu0 %v2662_v5 }
 0x57c   :  { %2667 = vmatprep.subr.bf16.mxu0 %v2666_v10 }
 0x57f   :  { %2669 = vmatpush3.bf16.msra.mxu0 %v2666_v10 }
 0x580   :  { %2671 = vmatprep.subr.bf16.mxu0 %v2670_v15 }
 0x583   :  { %2673 = vmatpush3.bf16.msra.mxu0 %v2670_v15 }
 0x584   :  { %2675 = vmatprep.subr.bf16.mxu0 %v2674_v18 }
 0x587   :  { %2677 = vmatpush3.bf16.msra.mxu0 %v2674_v18 }
 0x588   :  { %2679 = vmatprep.subr.bf16.mxu0 %v2678_v21 }
 0x58b   :  { %2681 = vmatpush3.bf16.msra.mxu0 %v2678_v21 }
 0x58c   :  { %2706 = vmatprep.subr.bf16.mxu0 %v2913_v11 }
 0x58e   :  { %2167 = vmatmul.mubr.f32.vlgmr.msra.gmra.mrb[8].mxu0 %v3125_v41  ;;  %v1555_v41 = vld [vmem:[%s3551_s2 + $0xe8] sm:$0xff] }
 0x58f   :  { %2169 = vmatprep.mubr.f32.mxu0 %v3147_v45  ;;  %2708 = vmatpush3.bf16.msra.mxu0 %v3272_v24  ;;  %v3332_v42 = vpack.c.bf16 %v1555_v41, %v1554_v40  ;;  %v3342_v45 = vpack.c.bf16 %v1557_v44, %v1556_v43 }
 0x590   :  { %2709 = vmatprep.subr.bf16.mxu0 %v2913_v11 }
 0x592   :  { %2170 = vmatmul.mubr.f32.gmra.mrb[10].mxu0 %v3169_v49 }
 0x593   :  { %2172 = vmatprep.mubr.f32.mxu0 %v3190_v53  ;;  %2711 = vmatpush3.bf16.msra.mxu0 %v3282_v27 }
 0x594   :  { %2712 = vmatprep.subr.bf16.mxu0 %v2913_v11 }
 0x596   :  { %2173 = vmatmul.mubr.f32.gmra.mrb[12].mxu0 %v2888_v63 }
 0x597   :  { %2714 = vmatpush3.bf16.msra.mxu0 %v3292_v30 }
 0x598   :  { %2715 = vmatprep.subr.bf16.mxu0 %v2913_v11 }
 0x59b   :  { %2717 = vmatpush3.bf16.msra.mxu0 %v3302_v33 }
 0x59c   :  { %2718 = vmatprep.subr.bf16.mxu0 %v2913_v11 }
 0x59f   :  { %2720 = vmatpush3.bf16.msra.mxu0 %v3312_v36 }
 0x5a0   :  { %2721 = vmatprep.subr.bf16.mxu0 %v2913_v11 }
 0x5a3   :  { %2723 = vmatpush3.bf16.msra.mxu0 %v3322_v39 }
 0x5a4   :  { %2724 = vmatprep.subr.bf16.mxu0 %v2913_v11 }
 0x5a7   :  { %2726 = vmatpush3.bf16.msra.mxu0 %v3332_v42 }
 0x5a8   :  { %2727 = vmatprep.subr.bf16.mxu0 %v2913_v11 }
 0x5ab   :  { %2729 = vmatpush3.bf16.msra.mxu0 %v3342_v45 }
 0x5ac   :  { %2754 = vmatprep.subr.bf16.mxu0 %v2913_v11 }
 0x641   :  { %v610_v46 = vpop.f32.mrb[6].mxu0 }
 0x642   :  { %v614_v47 = vadd.f32 %v610_v46, %v2974_v6  ;;  %v2098_v48 = vpop.f32.mrb[7].mxu0 }
 0x644   :  { %2889 = vtanh.f32 %v614_v47 }
 0x64e   :  { %v2890_v49 = vpop.eup %2889 }
 0x64f   :  { %2132 = vmatmul.mubr.f32.vlgmr.msra.gmra.mrb[6].mxu1 %v2890_v49  ;;  %2175 = vmatprep.mubr.f32.mxu0 %v2890_v49 }
 0x650   :  { %2684 = vmatpush3.bf16.msra.mxu1 %v3272_v24  ;;  %2210 = vmatprep.mubr.msk.f32.mxu1 %vm2914_vm0, %v2915_v14 }
 0x651   :  { %2685 = vmatprep.subr.bf16.mxu1 %v2913_v11 }
 0x654   :  { %2687 = vmatpush3.bf16.msra.mxu1 %v3282_v27 }
 0x655   :  { %2688 = vmatprep.subr.bf16.mxu1 %v2913_v11 }
 0x658   :  { %2690 = vmatpush3.bf16.msra.mxu1 %v3292_v30 }
 0x659   :  { %2691 = vmatprep.subr.bf16.mxu1 %v2913_v11 }
 0x65c   :  { %2693 = vmatpush3.bf16.msra.mxu1 %v3302_v33 }
 0x65d   :  { %2694 = vmatprep.subr.bf16.mxu1 %v2913_v11 }
 0x660   :  { %2696 = vmatpush3.bf16.msra.mxu1 %v3312_v36 }
 0x661   :  { %v3358_v6 = vpop.f32.mrb[8].mxu0  ;;  %2697 = vmatprep.subr.bf16.mxu1 %v2913_v11 }
 0x662   :  { %v791_v50 = vpop.f32.mrb[9].mxu0  ;;  %v797_v2 = vadd.f32 %v3358_v6, %v3400_v59 }
 0x663   :  { %v792_v60 = vadd.f32 %v3400_v59, %v791_v50 }
 0x664   :  { %2699 = vmatpush3.bf16.msra.mxu1 %v3322_v39 }
 0x665   :  { %v3362_v51 = vpop.f32.mrb[10].mxu0  ;;  %2700 = vmatprep.subr.bf16.mxu1 %v2913_v11 }
 0x666   :  { %v3365_v52 = vpop.f32.mrb[11].mxu0  ;;  %v807_v16 = vadd.f32 %v3362_v51, %v3400_v59 }
 0x667   :  { %v802_v9 = vadd.f32 %v3400_v59, %v3365_v52 }
 0x668   :  { %2702 = vmatpush3.bf16.msra.mxu1 %v3332_v42 }
 0x669   :  { %v3368_v53 = vpop.f32.mrb[12].mxu0  ;;  %2703 = vmatprep.subr.bf16.mxu1 %v2913_v11 }
 0x66a   :  { %v3371_v54 = vpop.f32.mrb[13].mxu0 }
 0x66b   :  { %v812_v21 = vadd.f32 %v3400_v59, %v3371_v54 }
 0x66c   :  { %2705 = vmatpush3.bf16.msra.mxu1 %v3342_v45 }
 0x66d   :  { %2730 = vmatprep.subr.bf16.mxu1 %v2913_v11 }
 0x66f   :  { %2211 = vmatmul.mubr.f32.vlgmr.msra.gmra.mrb[8].mxu1 %v2915_v14 }
 0x670   :  { %2732 = vmatpush3.bf16.msra.mxu1 %v3272_v24  ;;  %2280 = vmatprep.mubr.msk.f32.mxu1 %vm2914_vm0, %v2915_v14 }
 0x671   :  { %2733 = vmatprep.subr.bf16.mxu1 %v2913_v11 }
 0x674   :  { %2735 = vmatpush3.bf16.msra.mxu1 %v3282_v27 }
 0x675   :  { %2736 = vmatprep.subr.bf16.mxu1 %v2913_v11 }
 0x678   :  { %2738 = vmatpush3.bf16.msra.mxu1 %v3292_v30 }
 0x679   :  { %2739 = vmatprep.subr.bf16.mxu1 %v2913_v11 }
 0x67c   :  { %2741 = vmatpush3.bf16.msra.mxu1 %v3302_v33 }
 0x67d   :  { %2742 = vmatprep.subr.bf16.mxu1 %v2913_v11 }
 0x680   :  { %2744 = vmatpush3.bf16.msra.mxu1 %v3312_v36 }
 0x681   :  { %2745 = vmatprep.subr.bf16.mxu1 %v2913_v11 }
 0x684   :  { %2747 = vmatpush3.bf16.msra.mxu1 %v3322_v39 }
 0x685   :  { %2748 = vmatprep.subr.bf16.mxu1 %v2913_v11 }
 0x688   :  { %2750 = vmatpush3.bf16.msra.mxu1 %v3332_v42 }
 0x689   :  { %2751 = vmatprep.subr.bf16.mxu1 %v2913_v11 }
 0x68c   :  { %2753 = vmatpush3.bf16.msra.mxu1 %v3342_v45 }
 0x68d   :  { %2778 = vmatprep.subr.bf16.mxu1 %v2913_v11 }
 0x722   :  { %v685_v55 = vpop.f32.mrb[6].mxu1 }
 0x723   :  { %v689_v56 = vadd.f32 %v685_v55, %v2979_v7  ;;  %v2133_v57 = vpop.f32.mrb[7].mxu1 }
 0x725   :  { %2891 = vtanh.f32 %v689_v56 }
 0x72f   :  { %v2892_v58 = vpop.eup %2891 }
 0x730   :  { %2176 = vmatmul.mubr.f32.gmra.mrb[14].mxu0 %v2892_v58 }
 0x731   :  { %2245 = vmatprep.mubr.msk.f32.mxu0 %vm2914_vm0, %v2915_v14 }
 0x742   :  { %v922_v61 = vpop.f32.mrb[8].mxu1 }
 0x743   :  { %v926_v62 = vadd.f32 %v922_v61, %v792_v60  ;;  %v2212_v63 = vpop.f32.mrb[9].mxu1 }
 0x745   :  { %2893 = vtanh.f32 %v926_v62 }
 0x74f   :  { %v3403_v0 = vpop.eup %2893 }
 0x750   :  { %2246 = vmatmul.mubr.f32.vlgmr.msra.gmra.mrb[16].mxu0 %v3403_v0 }
 0x751   :  { %2756 = vmatpush3.bf16.msra.mxu0 %v3272_v24  ;;  %2315 = vmatprep.mubr.msk.f32.mxu0 %vm2914_vm0, %v2915_v14 }
 0x752   :  { %2757 = vmatprep.subr.bf16.mxu0 %v2913_v11 }
 0x755   :  { %2759 = vmatpush3.bf16.msra.mxu0 %v3282_v27 }
 0x756   :  { %2760 = vmatprep.subr.bf16.mxu0 %v2913_v11 }
 0x759   :  { %2762 = vmatpush3.bf16.msra.mxu0 %v3292_v30 }
 0x75a   :  { %2763 = vmatprep.subr.bf16.mxu0 %v2913_v11 }
 0x75d   :  { %2765 = vmatpush3.bf16.msra.mxu0 %v3302_v33 }
 0x75e   :  { %2766 = vmatprep.subr.bf16.mxu0 %v2913_v11 }
 0x761   :  { %2768 = vmatpush3.bf16.msra.mxu0 %v3312_v36 }
 0x762   :  { %2769 = vmatprep.subr.bf16.mxu0 %v2913_v11 }
 0x765   :  { %2771 = vmatpush3.bf16.msra.mxu0 %v3322_v39 }
 0x766   :  { %2772 = vmatprep.subr.bf16.mxu0 %v2913_v11 }
 0x769   :  { %2774 = vmatpush3.bf16.msra.mxu0 %v3332_v42 }
 0x76a   :  { %2775 = vmatprep.subr.bf16.mxu0 %v2913_v11 }
 0x76d   :  { %2777 = vmatpush3.bf16.msra.mxu0 %v3342_v45 }
 0x76e   :  { %2802 = vmatprep.subr.bf16.mxu0 %v2913_v11 }
 0x803   :  { %v3424_v7 = vpop.f32.mrb[14].mxu0 }
 0x804   :  { %v3426_v1 = vpop.f32.mrb[15].mxu0 }
 0x823   :  { %v996_v3 = vpop.f32.mrb[16].mxu0 }
 0x824   :  { %v1000_v4 = vadd.f32 %v996_v3, %v797_v2  ;;  %v2247_v5 = vpop.f32.mrb[17].mxu0 }
 0x826   :  { %2895 = vtanh.f32 %v1000_v4 }
 0x830   :  { %v3430_v8 = vpop.eup %2895 }
 0x831   :  { %2281 = vmatmul.mubr.f32.vlgmr.msra.gmra.mrb[10].mxu1 %v3430_v8 }
 0x832   :  { %2780 = vmatpush3.bf16.msra.mxu1 %v3272_v24  ;;  %2350 = vmatprep.mubr.msk.f32.mxu1 %vm2914_vm0, %v2915_v14 }
 0x833   :  { %2781 = vmatprep.subr.bf16.mxu1 %v2913_v11 }
 0x836   :  { %2783 = vmatpush3.bf16.msra.mxu1 %v3282_v27 }
 0x837   :  { %2784 = vmatprep.subr.bf16.mxu1 %v2913_v11 }
 0x83a   :  { %2786 = vmatpush3.bf16.msra.mxu1 %v3292_v30 }
 0x83b   :  { %2787 = vmatprep.subr.bf16.mxu1 %v2913_v11 }
 0x83e   :  { %2789 = vmatpush3.bf16.msra.mxu1 %v3302_v33 }
 0x83f   :  { %2790 = vmatprep.subr.bf16.mxu1 %v2913_v11 }
 0x842   :  { %2792 = vmatpush3.bf16.msra.mxu1 %v3312_v36 }
 0x843   :  { %2793 = vmatprep.subr.bf16.mxu1 %v2913_v11 }
 0x846   :  { %2795 = vmatpush3.bf16.msra.mxu1 %v3322_v39 }
 0x847   :  { %2796 = vmatprep.subr.bf16.mxu1 %v2913_v11 }
 0x84a   :  { %2798 = vmatpush3.bf16.msra.mxu1 %v3332_v42 }
 0x84b   :  { %2799 = vmatprep.subr.bf16.mxu1 %v2913_v11 }
 0x84e   :  { %2801 = vmatpush3.bf16.msra.mxu1 %v3342_v45 }
 0x84f   :  { %2826 = vmatprep.subr.bf16.mxu1 %v2913_v11 }
 0x904   :  { %v1070_v10 = vpop.f32.mrb[10].mxu1 }
 0x905   :  { %v1074_v12 = vadd.f32 %v1070_v10, %v802_v9  ;;  %v2282_v13 = vpop.f32.mrb[11].mxu1 }
 0x907   :  { %2897 = vtanh.f32 %v1074_v12 }
 0x911   :  { %v3453_v15 = vpop.eup %2897 }
 0x912   :  { %2316 = vmatmul.mubr.f32.vlgmr.msra.gmra.mrb[18].mxu0 %v3453_v15 }
 0x913   :  { %2804 = vmatpush3.bf16.msra.mxu0 %v3272_v24  ;;  %2385 = vmatprep.mubr.msk.f32.mxu0 %vm2914_vm0, %v2915_v14 }
 0x914   :  { %2805 = vmatprep.subr.bf16.mxu0 %v2913_v11 }
 0x917   :  { %2807 = vmatpush3.bf16.msra.mxu0 %v3282_v27 }
 0x918   :  { %2808 = vmatprep.subr.bf16.mxu0 %v2913_v11 }
 0x91b   :  { %2810 = vmatpush3.bf16.msra.mxu0 %v3292_v30 }
 0x91c   :  { %2811 = vmatprep.subr.bf16.mxu0 %v2913_v11 }
 0x91f   :  { %2813 = vmatpush3.bf16.msra.mxu0 %v3302_v33 }
 0x920   :  { %2814 = vmatprep.subr.bf16.mxu0 %v2913_v11 }
 0x923   :  { %2816 = vmatpush3.bf16.msra.mxu0 %v3312_v36 }
 0x924   :  { %2817 = vmatprep.subr.bf16.mxu0 %v2913_v11 }
 0x927   :  { %2819 = vmatpush3.bf16.msra.mxu0 %v3322_v39 }
 0x928   :  { %2820 = vmatprep.subr.bf16.mxu0 %v2913_v11 }
 0x92b   :  { %2822 = vmatpush3.bf16.msra.mxu0 %v3332_v42 }
 0x92c   :  { %2823 = vmatprep.subr.bf16.mxu0 %v2913_v11 }
 0x92f   :  { %2825 = vmatpush3.bf16.msra.mxu0 %v3342_v45 }
 0x930   :  { %2850 = vmatprep.subr.bf16.mxu0 %v2913_v11 }
 0x9e5   :  { %v1144_v17 = vpop.f32.mrb[18].mxu0 }
 0x9e6   :  { %v1148_v18 = vadd.f32 %v1144_v17, %v807_v16  ;;  %v2317_v19 = vpop.f32.mrb[19].mxu0 }
 0x9e8   :  { %2899 = vtanh.f32 %v1148_v18 }
 0x9f2   :  { %v3476_v20 = vpop.eup %2899 }
 0x9f3   :  { %2351 = vmatmul.mubr.f32.vlgmr.msra.gmra.mrb[12].mxu1 %v3476_v20 }
 0x9f4   :  { %2828 = vmatpush3.bf16.msra.mxu1 %v3272_v24  ;;  %2420 = vmatprep.mubr.msk.f32.mxu1 %vm2914_vm0, %v2915_v14 }
 0x9f5   :  { %2829 = vmatprep.subr.bf16.mxu1 %v2913_v11 }
 0x9f8   :  { %2831 = vmatpush3.bf16.msra.mxu1 %v3282_v27 }
 0x9f9   :  { %2832 = vmatprep.subr.bf16.mxu1 %v2913_v11 }
 0x9fc   :  { %2834 = vmatpush3.bf16.msra.mxu1 %v3292_v30 }
 0x9fd   :  { %2835 = vmatprep.subr.bf16.mxu1 %v2913_v11 }
 0xa00   :  { %2837 = vmatpush3.bf16.msra.mxu1 %v3302_v33 }
 0xa01   :  { %2838 = vmatprep.subr.bf16.mxu1 %v2913_v11 }
 0xa04   :  { %2840 = vmatpush3.bf16.msra.mxu1 %v3312_v36 }
 0xa05   :  { %2841 = vmatprep.subr.bf16.mxu1 %v2913_v11 }
 0xa08   :  { %2843 = vmatpush3.bf16.msra.mxu1 %v3322_v39 }
 0xa09   :  { %2844 = vmatprep.subr.bf16.mxu1 %v2913_v11 }
 0xa0c   :  { %2846 = vmatpush3.bf16.msra.mxu1 %v3332_v42 }
 0xa0d   :  { %2847 = vmatprep.subr.bf16.mxu1 %v2913_v11 }
 0xa10   :  { %2849 = vmatpush3.bf16.msra.mxu1 %v3342_v45 }
 0xac6   :  { %v1218_v22 = vpop.f32.mrb[12].mxu1 }
 0xac7   :  { %v1222_v23 = vadd.f32 %v1218_v22, %v812_v21  ;;  %v2352_v25 = vpop.f32.mrb[13].mxu1 }
 0xac9   :  { %2901 = vtanh.f32 %v1222_v23 }
 0xad3   :  { %v2902_v26 = vpop.eup %2901 }
 0xad4   :  { %2386 = vmatmul.mubr.f32.vlgmr.msra.gmra.mrb[20].mxu0 %v2902_v26 }
 0xad5   :  { %2852 = vmatpush3.bf16.msra.mxu0 %v3272_v24  ;;  %2455 = vmatprep.mubr.msk.f32.mxu0 %vm2914_vm0, %v2915_v14  ;;  %v817_v14 = vadd.f32 %v3368_v53, %v3400_v59 }
 0xad6   :  { %2853 = vmatprep.subr.bf16.mxu0 %v2913_v11 }
 0xad9   :  { %2855 = vmatpush3.bf16.msra.mxu0 %v3282_v27 }
 0xada   :  { %2856 = vmatprep.subr.bf16.mxu0 %v2913_v11 }
 0xadd   :  { %2858 = vmatpush3.bf16.msra.mxu0 %v3292_v30  ;;  %v822_v30 = vadd.f32 %v3400_v59, %v3426_v1 }
 0xade   :  { %2859 = vmatprep.subr.bf16.mxu0 %v2913_v11 }
 0xae1   :  { %2861 = vmatpush3.bf16.msra.mxu0 %v3302_v33 }
 0xae2   :  { %2862 = vmatprep.subr.bf16.mxu0 %v2913_v11 }
 0xae5   :  { %2864 = vmatpush3.bf16.msra.mxu0 %v3312_v36 }
 0xae6   :  { %2865 = vmatprep.subr.bf16.mxu0 %v2913_v11 }
 0xae9   :  { %2867 = vmatpush3.bf16.msra.mxu0 %v3322_v39 }
 0xaea   :  { %2868 = vmatprep.subr.bf16.mxu0 %v2913_v11 }
 0xaed   :  { %2870 = vmatpush3.bf16.msra.mxu0 %v3332_v42 }
 0xaee   :  { %2871 = vmatprep.subr.bf16.mxu0 %v2913_v11  ;;  %v827_v11 = vadd.f32 %v3424_v7, %v3400_v59 }
 0xaf1   :  { %2873 = vmatpush3.bf16.msra.mxu0 %v3342_v45 }
 0xba7   :  { %v1292_v24 = vpop.f32.mrb[20].mxu0 }
 0xba8   :  { %v1296_v27 = vadd.f32 %v1292_v24, %v817_v14  ;;  %v2387_v28 = vpop.f32.mrb[21].mxu0 }
 0xbaa   :  { %2903 = vtanh.f32 %v1296_v27 }
 0xbb4   :  { %v2904_v29 = vpop.eup %2903 }
 0xbb5   :  { %2421 = vmatmul.mubr.f32.vlgmr.msra.gmra.mrb[14].mxu1 %v2904_v29 }
 0xc88   :  { %v1366_v31 = vpop.f32.mrb[14].mxu1 }
 0xc89   :  { %v1370_v32 = vadd.f32 %v1366_v31, %v822_v30  ;;  %v2422_v33 = vpop.f32.mrb[15].mxu1 }
 0xc8b   :  { %2905 = vtanh.f32 %v1370_v32 }
 0xc95   :  { %v2906_v34 = vpop.eup %2905 }
 0xc96   :  { %2456 = vmatmul.mubr.f32.vlgmr.msra.gmra.mrb[22].mxu0 %v2906_v34 }
 0xd69   :  { %v1440_v35 = vpop.f32.mrb[22].mxu0 }
 0xd6a   :  { %v1444_v36 = vadd.f32 %v1440_v35, %v827_v11  ;;  %v2457_v37 = vpop.f32.mrb[23].mxu0 }
 0xd6c   :  { %2907 = vtanh.f32 %v1444_v36 }
 0xd76   :  { %v2908_v38 = vpop.eup %2907 }
 0xd77   :  { %1481 = vst [vmem:[%s3553_s4] sm:$0xff] %v3403_v0  ;;  %1483 = vst [vmem:[%s3553_s4 + $0x8] sm:$0xff] %v3430_v8 }
 0xd78   :  { %1485 = vst [vmem:[%s3553_s4 + $0x10] sm:$0xff] %v3453_v15  ;;  %1487 = vst [vmem:[%s3553_s4 + $0x18] sm:$0xff] %v3476_v20 }
 0xd79   :  { %1489 = vst [vmem:[%s3553_s4 + $0x20] sm:$0xff] %v2902_v26  ;;  %1491 = vst [vmem:[%s3553_s4 + $0x28] sm:$0xff] %v2904_v29 }
 0xd7a   :  { %1493 = vst [vmem:[%s3553_s4 + $0x30] sm:$0xff] %v2906_v34  ;;  %1495 = vst [vmem:[%s3553_s4 + $0x38] sm:$0xff] %v2908_v38 }
 0xd7b   :  { %1503 = vsyncadd [#allocation5], 1024 }
 0xd7c   :  { %2911 = dma.done.wait [#allocation5], 1024 }
 0xd7d   :  { %2912 = vsyncadd [#allocation5], 4294966272 }

</bundles_post_ra>
